<compile_context>
chip_gen: v7x
topology: tpu7x:2x2x1
jax: 0.10.0
libtpu: 0.0.40
codegen_flags: <defaults>
</compile_context>

<pallas_src>
import jax
import jax.numpy as jnp
from jax.experimental import pallas as pl
from jax.experimental.pallas import tpu as pltpu

BN_EPS = 1e-5
LANE = 128


def _round_up(n, m):
    return ((n + m - 1) // m) * m


# ---------------------------------------------------------------------------
# Kernel: one fused chain over the block-diagonal weights of both branches.
#   x -> ReLU(x @ W1 + b1) -> @W2 + b2 -> @W3 + b3 -> @W4 + b4
# ---------------------------------------------------------------------------
def _fused_kernel(x_ref, w1_ref, w2_ref, w3_ref, w4_ref, b_ref, out_ref):
    h2 = w1_ref.shape[1]       # 2 * hidden
    q2 = w2_ref.shape[1]       # 2 * (hidden // 4)
    nc_pad = out_ref.shape[1]  # lane-padded num_classes (multiple of 128)

    x = x_ref[...]  # (B, Ta*Da + Tv*Dv)

    # Layer 1: temporal mean + Linear + BatchNorm(eval) are all folded into W1/b1.
    h = jnp.dot(x, w1_ref[...], preferred_element_type=jnp.float32)
    h = jnp.maximum(h + b_ref[0:1, :h2], 0.0)  # ReLU; Dropout = identity (eval)

    h = jnp.dot(h, w2_ref[...], preferred_element_type=jnp.float32) + b_ref[1:2, :q2]
    h = jnp.dot(h, w3_ref[...], preferred_element_type=jnp.float32) + b_ref[2:3, :q2]

    # Final layer carries the 0.5 * (audio + video) fusion; output is lane-dense.
    out_ref[...] = (
        jnp.dot(h, w4_ref[...], preferred_element_type=jnp.float32)
        + b_ref[3:4, :nc_pad]
    )


# ---------------------------------------------------------------------------
# One-time host-side parameter fusion.
# ---------------------------------------------------------------------------
def _block_diag(a, b):
    ra, ca = a.shape
    rb, cb = b.shape
    top = jnp.concatenate([a, jnp.zeros((ra, cb), a.dtype)], axis=1)
    bot = jnp.concatenate([jnp.zeros((rb, ca), b.dtype), b], axis=1)
    return jnp.concatenate([top, bot], axis=0)


def _fold_branch(params, T):
    """Fold BN(eval) into W1/b1 and the temporal mean (1/T) into a tiled W1."""
    w1, b1, gamma, beta, rmean, rvar, w2, b2, w3, b3, w4, b4 = params
    scale = gamma / jnp.sqrt(rvar + BN_EPS)            # (1, hidden)
    w1f = w1 * scale                                   # column-wise scale
    b1f = (b1 - rmean) * scale + beta
    w1t = jnp.tile(w1f, (T, 1)) / T                    # (T*embed, hidden): mean folded in
    return w1t, b1f, w2, b2, w3, b3, w4, b4


def build_fused_params(audio_params, video_params, Ta, Tv, num_classes):
    wa1, ba1, wa2, ba2, wa3, ba3, wa4, ba4 = _fold_branch(audio_params, Ta)
    wv1, bv1, wv2, bv2, wv3, bv3, wv4, bv4 = _fold_branch(video_params, Tv)

    W1 = _block_diag(wa1, wv1)                         # (Ta*Da + Tv*Dv, 2*hidden)
    W2 = _block_diag(wa2, wv2)                         # (2*hidden, 2*h4)
    W3 = _block_diag(wa3, wv3)                         # (2*h4, 2*h4)

    # Final layer: stack vertically and fold the *0.5 averaging of the two branches.
    W4 = jnp.concatenate([0.5 * wa4, 0.5 * wv4], axis=0)   # (2*h4, num_classes)
    b4 = 0.5 * (ba4 + bv4)                                 # (1, num_classes)

    h2 = W1.shape[1]
    q2 = W2.shape[1]
    nc_pad = _round_up(num_classes, LANE)
    pack_w = _round_up(max(h2, q2, num_classes), LANE)

    # Lane-pad the last weight / bias so the output store is unmasked & lane-dense.
    W4p = jnp.pad(W4, ((0, 0), (0, nc_pad - num_classes)))

    def row(v):
        return jnp.pad(v, ((0, 0), (0, pack_w - v.shape[1])))

    b1 = jnp.concatenate([ba1, bv1], axis=1)           # (1, 2*hidden)
    b2 = jnp.concatenate([ba2, bv2], axis=1)           # (1, 2*h4)
    b3 = jnp.concatenate([ba3, bv3], axis=1)           # (1, 2*h4)
    biases = jnp.concatenate([row(b1), row(b2), row(b3), row(b4)], axis=0)  # (4, pack_w)

    return (W1, W2, W3, W4p, biases, nc_pad)


# ---------------------------------------------------------------------------
# Wrapper.
# ---------------------------------------------------------------------------
def mean_concat_late_fused(audio, video, fused, num_classes):
    B, Ta, Da = audio.shape
    _, Tv, Dv = video.shape
    W1, W2, W3, W4p, biases, nc_pad = fused

    # Flatten time into features (layout plumbing in the wrapper) and concat the
    # two branches so the kernel sees a single lane-dense input slab.
    x = jnp.concatenate(
        [audio.reshape(B, Ta * Da), video.reshape(B, Tv * Dv)], axis=1
    )

    inputs = [x, W1, W2, W3, W4p, biases]
    in_specs = [
        pl.BlockSpec(a.shape, lambda i, _nd=a.ndim: (0,) * _nd) for a in inputs
    ]
    out_shape = jax.ShapeDtypeStruct((B, nc_pad), jnp.float32)
    out_spec = pl.BlockSpec((B, nc_pad), lambda i: (0, 0))

    # NOTE: grid=(1,) on purpose — at this size per-step grid overhead exceeds
    # the compute.  For large B (v7x megacore), grid over B and mark "parallel".
    out = pl.pallas_call(
        _fused_kernel,
        out_shape=out_shape,
        grid=(1,),
        in_specs=in_specs,
        out_specs=out_spec,
        compiler_params=pltpu.CompilerParams(dimension_semantics=("arbitrary",)),
    )(*inputs)

    return out[:, :num_classes]


def mean_concat_late(audio, video, audio_params, video_params, num_classes):
    _, Ta, _ = audio.shape
    _, Tv, _ = video.shape
    fused = build_fused_params(audio_params, video_params, Ta, Tv, num_classes)
    return mean_concat_late_fused(audio, video, fused, num_classes)


# ---------------------------------------------------------------------------
# Synthetic parameters + pure-JAX reference.
# ---------------------------------------------------------------------------
def init_branch_params(key, embed_dim, hidden_dim, num_classes):
    """Deterministic synthetic parameters for one branch (eval-mode BN stats)."""
    h4 = hidden_dim // 4
    ks = jax.random.split(key, 10)

    def lin(k, din, dout):
        kw, kb = jax.random.split(k)
        w = jax.random.normal(kw, (din, dout), jnp.float32) * (1.0 / jnp.sqrt(din))
        b = jax.random.normal(kb, (1, dout), jnp.float32) * 0.01
        return w, b

    w1, b1 = lin(ks[0], embed_dim, hidden_dim)
    gamma = 1.0 + 0.1 * jax.random.normal(ks[1], (1, hidden_dim), jnp.float32)
    beta = 0.1 * jax.random.normal(ks[2], (1, hidden_dim), jnp.float32)
    rmean = 0.1 * jax.random.normal(ks[3], (1, hidden_dim), jnp.float32)
    rvar = jax.random.uniform(ks[4], (1, hidden_dim), jnp.float32, 0.5, 1.5)
    w2, b2 = lin(ks[5], hidden_dim, h4)
    w3, b3 = lin(ks[6], h4, h4)
    w4, b4 = lin(ks[7], h4, num_classes)
    return (w1, b1, gamma, beta, rmean, rvar, w2, b2, w3, b3, w4, b4)


def reference_forward(audio, video, audio_params, video_params):
    """Pure-JAX reference (eval-mode BN, Dropout=identity)."""
    def branch(x, p):
        (w1, b1, g, be, rm, rv, w2, b2, w3, b3, w4, b4) = p
        h = x @ w1 + b1
        h = (h - rm) / jnp.sqrt(rv + BN_EPS) * g + be
        h = jnp.maximum(h, 0.0)
        h = h @ w2 + b2
        h = h @ w3 + b3
        h = h @ w4 + b4
        return h

    a = branch(audio.mean(axis=1), audio_params)
    v = branch(video.mean(axis=1), video_params)
    return (a + v) * 0.5


if __name__ == "__main__":
    B = 8
    Ta, Tv = 6, 4
    audio_embed_dim = 32
    video_embed_dim = 48
    hidden_dim = 32
    num_classes = 10

    key = jax.random.PRNGKey(0)
    k_a, k_v, k_pa, k_pv = jax.random.split(key, 4)

    audio = jax.random.normal(k_a, (B, Ta, audio_embed_dim), jnp.float32)
    video = jax.random.normal(k_v, (B, Tv, video_embed_dim), jnp.float32)

    audio_params = init_branch_params(k_pa, audio_embed_dim, hidden_dim, num_classes)
    video_params = init_branch_params(k_pv, video_embed_dim, hidden_dim, num_classes)

    out = mean_concat_late(audio, video, audio_params, video_params, num_classes)
    out = jax.block_until_ready(out)

    ref = reference_forward(audio, video, audio_params, video_params)
    assert out.shape == (B, num_classes)
    assert jnp.allclose(out, ref, atol=1e-4, rtol=1e-4), "mismatch vs reference"

    # TODO(synk): BatchNorm1d is implemented with eval-mode running stats
    # (training-mode batch statistics are not modeled); Dropout is identity.
    print("KERNEL_OK")
</pallas_src>

<mosaic_0001>
module attributes {stable_mosaic.version = 11 : i64} {
  func.func @_fused_kernel(%arg0: i32, %arg1: memref<8x384xf32, #tpu.memory_space<vmem>>, %arg2: memref<384x64xf32, #tpu.memory_space<vmem>>, %arg3: memref<64x16xf32, #tpu.memory_space<vmem>>, %arg4: memref<16x16xf32, #tpu.memory_space<vmem>>, %arg5: memref<16x128xf32, #tpu.memory_space<vmem>>, %arg6: memref<4x128xf32, #tpu.memory_space<vmem>>, %arg7: memref<8x128xf32, #tpu.memory_space<vmem>>) attributes {dimension_semantics = [#tpu.dimension_semantics<arbitrary>], iteration_bounds = array<i64: 1>, scalar_prefetch = 0 : i64, scratch_operands = 0 : i64, tpu.core_type = #tpu.core_type<tc>, window_params = [{pipeline_mode = #tpu.pipeline_mode<synchronous>, transform_indices = @transform_0, window_bounds = array<i64: 8, 384>}, {pipeline_mode = #tpu.pipeline_mode<synchronous>, transform_indices = @transform_1, window_bounds = array<i64: 384, 64>}, {pipeline_mode = #tpu.pipeline_mode<synchronous>, transform_indices = @transform_2, window_bounds = array<i64: 64, 16>}, {pipeline_mode = #tpu.pipeline_mode<synchronous>, transform_indices = @transform_3, window_bounds = array<i64: 16, 16>}, {pipeline_mode = #tpu.pipeline_mode<synchronous>, transform_indices = @transform_4, window_bounds = array<i64: 16, 128>}, {pipeline_mode = #tpu.pipeline_mode<synchronous>, transform_indices = @transform_5, window_bounds = array<i64: 4, 128>}, {pipeline_mode = #tpu.pipeline_mode<synchronous>, transform_indices = @transform_6, window_bounds = array<i64: 8, 128>}]} {
    %c0 = arith.constant 0 : index
    %c0_0 = arith.constant 0 : index
    %0 = vector.load %arg1[%c0, %c0_0] : memref<8x384xf32, #tpu.memory_space<vmem>>, vector<8x384xf32>
    %c0_1 = arith.constant 0 : index
    %c0_2 = arith.constant 0 : index
    %1 = vector.load %arg2[%c0_1, %c0_2] : memref<384x64xf32, #tpu.memory_space<vmem>>, vector<384x64xf32>
    %cst = arith.constant dense<0.000000e+00> : vector<8x64xf32>
    %2 = tpu.matmul %0, %1, %cst {dimension_numbers = #tpu.dot_dimension_numbers<[1], [0], [0], [1], [0, 0, 1, 1], [], []>} : vector<8x384xf32>, vector<384x64xf32>, vector<8x64xf32> -> vector<8x64xf32>
    %c0_3 = arith.constant 0 : index
    %c0_4 = arith.constant 0 : index
    %3 = vector.load %arg6[%c0_3, %c0_4] : memref<4x128xf32, #tpu.memory_space<vmem>>, vector<1x64xf32>
    %4 = vector.broadcast %3 : vector<1x64xf32> to vector<8x64xf32>
    %5 = arith.addf %2, %4 : vector<8x64xf32>
    %cst_5 = arith.constant 0.000000e+00 : f32
    %6 = vector.broadcast %cst_5 : f32 to vector<8x64xf32>
    %7 = arith.maximumf %5, %6 : vector<8x64xf32>
    %c0_6 = arith.constant 0 : index
    %c0_7 = arith.constant 0 : index
    %8 = vector.load %arg3[%c0_6, %c0_7] : memref<64x16xf32, #tpu.memory_space<vmem>>, vector<64x16xf32>
    %cst_8 = arith.constant dense<0.000000e+00> : vector<8x16xf32>
    %9 = tpu.matmul %7, %8, %cst_8 {dimension_numbers = #tpu.dot_dimension_numbers<[1], [0], [0], [1], [0, 0, 1, 1], [], []>} : vector<8x64xf32>, vector<64x16xf32>, vector<8x16xf32> -> vector<8x16xf32>
    %c1 = arith.constant 1 : index
    %c0_9 = arith.constant 0 : index
    %10 = vector.load %arg6[%c1, %c0_9] : memref<4x128xf32, #tpu.memory_space<vmem>>, vector<1x16xf32>
    %11 = vector.broadcast %10 : vector<1x16xf32> to vector<8x16xf32>
    %12 = arith.addf %9, %11 : vector<8x16xf32>
    %c0_10 = arith.constant 0 : index
    %c0_11 = arith.constant 0 : index
    %13 = vector.load %arg4[%c0_10, %c0_11] : memref<16x16xf32, #tpu.memory_space<vmem>>, vector<16x16xf32>
    %cst_12 = arith.constant dense<0.000000e+00> : vector<8x16xf32>
    %14 = tpu.matmul %12, %13, %cst_12 {dimension_numbers = #tpu.dot_dimension_numbers<[1], [0], [0], [1], [0, 0, 1, 1], [], []>} : vector<8x16xf32>, vector<16x16xf32>, vector<8x16xf32> -> vector<8x16xf32>
    %c2 = arith.constant 2 : index
    %c0_13 = arith.constant 0 : index
    %15 = vector.load %arg6[%c2, %c0_13] : memref<4x128xf32, #tpu.memory_space<vmem>>, vector<1x16xf32>
    %16 = vector.broadcast %15 : vector<1x16xf32> to vector<8x16xf32>
    %17 = arith.addf %14, %16 : vector<8x16xf32>
    %c0_14 = arith.constant 0 : index
    %c0_15 = arith.constant 0 : index
    %18 = vector.load %arg5[%c0_14, %c0_15] : memref<16x128xf32, #tpu.memory_space<vmem>>, vector<16x128xf32>
    %cst_16 = arith.constant dense<0.000000e+00> : vector<8x128xf32>
    %19 = tpu.matmul %17, %18, %cst_16 {dimension_numbers = #tpu.dot_dimension_numbers<[1], [0], [0], [1], [0, 0, 1, 1], [], []>} : vector<8x16xf32>, vector<16x128xf32>, vector<8x128xf32> -> vector<8x128xf32>
    %c3 = arith.constant 3 : index
    %c0_17 = arith.constant 0 : index
    %20 = vector.load %arg6[%c3, %c0_17] : memref<4x128xf32, #tpu.memory_space<vmem>>, vector<1x128xf32>
    %21 = vector.broadcast %20 : vector<1x128xf32> to vector<8x128xf32>
    %22 = arith.addf %19, %21 : vector<8x128xf32>
    %c0_18 = arith.constant 0 : index
    %c0_19 = arith.constant 0 : index
    %23 = vector.load %arg7[%c0_18, %c0_19] : memref<8x128xf32, #tpu.memory_space<vmem>>, vector<8x128xf32>
    tpu.vector_store %arg7[%c0_18, %c0_19], %22 {strides = array<i32>} : memref<8x128xf32, #tpu.memory_space<vmem>>, vector<8x128xf32>,
    return
  }
  func.func @transform_0(%arg0: i32) -> (i32, i32) {
    %c0_i32 = arith.constant 0 : i32
    %c0_i32_0 = arith.constant 0 : i32
    %c0_i32_1 = arith.constant 0 : i32
    return %c0_i32, %c0_i32_0 : i32, i32
  }
  func.func @transform_1(%arg0: i32) -> (i32, i32) {
    %c0_i32 = arith.constant 0 : i32
    %c0_i32_0 = arith.constant 0 : i32
    %c0_i32_1 = arith.constant 0 : i32
    return %c0_i32, %c0_i32_0 : i32, i32
  }
  func.func @transform_2(%arg0: i32) -> (i32, i32) {
    %c0_i32 = arith.constant 0 : i32
    %c0_i32_0 = arith.constant 0 : i32
    %c0_i32_1 = arith.constant 0 : i32
    return %c0_i32, %c0_i32_0 : i32, i32
  }
  func.func @transform_3(%arg0: i32) -> (i32, i32) {
    %c0_i32 = arith.constant 0 : i32
    %c0_i32_0 = arith.constant 0 : i32
    %c0_i32_1 = arith.constant 0 : i32
    return %c0_i32, %c0_i32_0 : i32, i32
  }
  func.func @transform_4(%arg0: i32) -> (i32, i32) {
    %c0_i32 = arith.constant 0 : i32
    %c0_i32_0 = arith.constant 0 : i32
    %c0_i32_1 = arith.constant 0 : i32
    return %c0_i32, %c0_i32_0 : i32, i32
  }
  func.func @transform_5(%arg0: i32) -> (i32, i32) {
    %c0_i32 = arith.constant 0 : i32
    %c0_i32_0 = arith.constant 0 : i32
    %c0_i32_1 = arith.constant 0 : i32
    return %c0_i32, %c0_i32_0 : i32, i32
  }
  func.func @transform_6(%arg0: i32) -> (i32, i32) {
    %c0_i32 = arith.constant 0 : i32
    %c0_i32_0 = arith.constant 0 : i32
    %c0_i32_1 = arith.constant 0 : i32
    return %c0_i32, %c0_i32_0 : i32, i32
  }
}

</mosaic_0001>

<bundles_post_ra>
// kernel: tpu_custom_call.1
= control target key start
LH: loop header
LB: loop body
LE: loop exit
PB: predicated region body
PF: predicated region fallthrough
CT: control target
= control target key end

     0   :  { %v728_v7 = vmov 0.0|0.0   ;;  %vm729_vm0 = vmmov 0   ;;  %v730_v8 = vmov 0.0   ;;  %s1002_s0 = inlined_call_operand.vmem [shape: f32[8,384], index: 0, kind: input, shape index: {}]   ;;  %s1003_s1 = inlined_call_operand.vmem [shape: f32[384,64], index: 1, kind: input, shape index: {}]   ;;  %s1004_s2 = inlined_call_operand.vmem [shape: f32[64,16], index: 2, kind: input, shape index: {}]   ;;  %s1005_s3 = inlined_call_operand.vmem [shape: f32[16,16], index: 3, kind: input, shape index: {}]   ;;  %s1006_s4 = inlined_call_operand.vmem [shape: f32[16,128], index: 4, kind: input, shape index: {}]   ;;  %s1007_s5 = inlined_call_operand.vmem [shape: f32[4,128], index: 5, kind: input, shape index: {}]   ;;  %s1008_s6 = inlined_call_operand.hbm [shape: f32[8,128], index: 6, kind: output, shape index: {}]  }
   0x1   :  { %v43_v0 = vld [vmem:[%s1003_s1 + $0x80] sm:$0xff]  ;;  %v44_v1 = vld [vmem:[%s1003_s1 + $0x88] sm:$0xff]  ;;  %v45_v5 = vld [vmem:[%s1003_s1 + $0x90] sm:$0xff]  ;;  %658 = vmatprep.subr.bf16.mxu1 %v728_v7  ;;  %590 = vmatprep.mubr.msk.f32.mxu1 %vm729_vm0, %v730_v8 }
   0x2   :  { %v27_v2 = vld [vmem:[%s1003_s1] sm:$0xff]  ;;  %v626_v3 = vpack.c.bf16 %v44_v1, %v43_v0  ;;  %v28_v4 = vld [vmem:[%s1003_s1 + $0x8] sm:$0xff]  ;;  %v46_v6 = vld [vmem:[%s1003_s1 + $0x98] sm:$0xff] }
   0x3   :  { %v628_v9 = vpack.c.bf16 %v28_v4, %v27_v2  ;;  %v630_v10 = vpack.c.bf16 %v46_v6, %v45_v5  ;;  %v29_v11 = vld [vmem:[%s1003_s1 + $0x10] sm:$0xff]  ;;  %v30_v12 = vld [vmem:[%s1003_s1 + $0x18] sm:$0xff]  ;;  %v59_v13 = vld [vmem:[%s1003_s1 + $0x100] sm:$0xff] }
   0x4   :  { %627 = vmatprep.subr.bf16.mxu0 %v626_v3  ;;  %v60_v14 = vld [vmem:[%s1003_s1 + $0x108] sm:$0xff]  ;;  %v47_v15 = vld [vmem:[%s1003_s1 + $0xa0] sm:$0xff]  ;;  %v632_v17 = vpack.c.bf16 %v30_v12, %v29_v11  ;;  %v61_v19 = vld [vmem:[%s1003_s1 + $0x110] sm:$0xff] }
   0x5   :  { %v48_v16 = vld [vmem:[%s1003_s1 + $0xa8] sm:$0xff]  ;;  %629 = vmatpush3.bf16.msra.mxu0 %v628_v9  ;;  %v659_v18 = vpack.c.bf16 %v60_v14, %v59_v13  ;;  %v31_v21 = vld [vmem:[%s1003_s1 + $0x20] sm:$0xff]  ;;  %v62_v23 = vld [vmem:[%s1003_s1 + $0x118] sm:$0xff] }
   0x6   :  { %631 = vmatprep.subr.bf16.mxu0 %v630_v10  ;;  %v634_v20 = vpack.c.bf16 %v48_v16, %v47_v15  ;;  %v32_v22 = vld [vmem:[%s1003_s1 + $0x28] sm:$0xff]  ;;  %v662_v24 = vpack.c.bf16 %v62_v23, %v61_v19  ;;  %v49_v25 = vld [vmem:[%s1003_s1 + $0xb0] sm:$0xff]  ;;  %v50_v26 = vld [vmem:[%s1003_s1 + $0xb8] sm:$0xff] }
   0x7   :  { %660 = vmatpush3.bf16.msra.mxu1 %v659_v18  ;;  %v63_v27 = vld [vmem:[%s1003_s1 + $0x120] sm:$0xff]  ;;  %v64_v28 = vld [vmem:[%s1003_s1 + $0x128] sm:$0xff]  ;;  %v636_v29 = vpack.c.bf16 %v32_v22, %v31_v21  ;;  %v638_v30 = vpack.c.bf16 %v50_v26, %v49_v25  ;;  %v33_v31 = vld [vmem:[%s1003_s1 + $0x30] sm:$0xff] }
   0x8   :  { %661 = vmatprep.subr.bf16.mxu1 %v728_v7  ;;  %v34_v32 = vld [vmem:[%s1003_s1 + $0x38] sm:$0xff]  ;;  %v665_v33 = vpack.c.bf16 %v64_v28, %v63_v27  ;;  %v51_v34 = vld [vmem:[%s1003_s1 + $0xc0] sm:$0xff]  ;;  %v52_v35 = vld [vmem:[%s1003_s1 + $0xc8] sm:$0xff] }
   0x9   :  { %633 = vmatpush3.bf16.msra.mxu0 %v632_v17  ;;  %v65_v36 = vld [vmem:[%s1003_s1 + $0x130] sm:$0xff]  ;;  %v66_v37 = vld [vmem:[%s1003_s1 + $0x138] sm:$0xff]  ;;  %v640_v38 = vpack.c.bf16 %v34_v32, %v33_v31  ;;  %v642_v39 = vpack.c.bf16 %v52_v35, %v51_v34  ;;  %v35_v40 = vld [vmem:[%s1003_s1 + $0x40] sm:$0xff] }
   0xa   :  { %635 = vmatprep.subr.bf16.mxu0 %v634_v20  ;;  %v36_v41 = vld [vmem:[%s1003_s1 + $0x48] sm:$0xff]  ;;  %v668_v42 = vpack.c.bf16 %v66_v37, %v65_v36  ;;  %v53_v43 = vld [vmem:[%s1003_s1 + $0xd0] sm:$0xff]  ;;  %v54_v44 = vld [vmem:[%s1003_s1 + $0xd8] sm:$0xff] }
   0xb   :  { %663 = vmatpush3.bf16.msra.mxu1 %v662_v24  ;;  %v67_v45 = vld [vmem:[%s1003_s1 + $0x140] sm:$0xff]  ;;  %v68_v46 = vld [vmem:[%s1003_s1 + $0x148] sm:$0xff]  ;;  %v644_v48 = vpack.c.bf16 %v36_v41, %v35_v40  ;;  %v646_v49 = vpack.c.bf16 %v54_v44, %v53_v43  ;;  %v37_v50 = vld [vmem:[%s1003_s1 + $0x50] sm:$0xff] }
   0xc   :  { %664 = vmatprep.subr.bf16.mxu1 %v728_v7  ;;  %v25_v47 = vld [vmem:[%s1002_s0 + $0x8] sm:$0xff]  ;;  %v38_v51 = vld [vmem:[%s1003_s1 + $0x58] sm:$0xff]  ;;  %v671_v52 = vpack.c.bf16 %v68_v46, %v67_v45  ;;  %v55_v53 = vld [vmem:[%s1003_s1 + $0xe0] sm:$0xff] }
   0xd   :  { %637 = vmatpush3.bf16.msra.mxu0 %v636_v29  ;;  %144 = vmatprep.mubr.f32.mxu0 %v25_v47  ;;  %v56_v54 = vld [vmem:[%s1003_s1 + $0xe8] sm:$0xff] }
   0xe   :  { %639 = vmatprep.subr.bf16.mxu0 %v638_v30 }
   0xf   :  { %666 = vmatpush3.bf16.msra.mxu1 %v665_v33 }
  0x10   :  { %667 = vmatprep.subr.bf16.mxu1 %v728_v7 }
  0x11   :  { %641 = vmatpush3.bf16.msra.mxu0 %v640_v38 }
  0x12   :  { %643 = vmatprep.subr.bf16.mxu0 %v642_v39 }
  0x13   :  { %669 = vmatpush3.bf16.msra.mxu1 %v668_v42 }
  0x14   :  { %11 = vsyncpa [#allocation3], 0  ;;  %670 = vmatprep.subr.bf16.mxu1 %v728_v7  ;;  %v69_v55 = vld [vmem:[%s1003_s1 + $0x150] sm:$0xff]  ;;  %v70_v56 = vld [vmem:[%s1003_s1 + $0x158] sm:$0xff]  ;;  %v648_v57 = vpack.c.bf16 %v38_v51, %v37_v50  ;;  %v650_v58 = vpack.c.bf16 %v56_v54, %v55_v53  ;;  %vm234_vm1 = vcmask 523264   ;;  %vm315_vm2 = vcmask 130048  }
  0x15   :  { %645 = vmatpush3.bf16.msra.mxu0 %v644_v48  ;;  %v39_v59 = vld [vmem:[%s1003_s1 + $0x60] sm:$0xff]  ;;  %v40_v60 = vld [vmem:[%s1003_s1 + $0x68] sm:$0xff]  ;;  %v674_v61 = vpack.c.bf16 %v70_v56, %v69_v55  ;;  %v57_v62 = vld [vmem:[%s1003_s1 + $0xf0] sm:$0xff]  ;;  %s731_s29 = smov [#allocation2]  }
  0x16   :  { %647 = vmatprep.subr.bf16.mxu0 %v646_v49  ;;  %v58_v63 = vld [vmem:[%s1003_s1 + $0xf8] sm:$0xff]  ;;  %v71_v0 = vld [vmem:[%s1003_s1 + $0x160] sm:$0xff]  ;;  %v72_v1 = vld [vmem:[%s1003_s1 + $0x168] sm:$0xff]  ;;  %v652_v2 = vpack.c.bf16 %v40_v60, %v39_v59  ;;  %s476_s30 = sshll.u32 %s731_s29, 4  ;;  %s477_s30 = int_to_ptr.vmem [resolvable:$true] %s476_s30 }
  0x17   :  { %672 = vmatpush3.bf16.msra.mxu1 %v671_v52  ;;  %v654_v3 = vpack.c.bf16 %v58_v63, %v57_v62  ;;  %v41_v4 = vld [vmem:[%s1003_s1 + $0x70] sm:$0xff]  ;;  %v42_v5 = vld [vmem:[%s1003_s1 + $0x78] sm:$0xff]  ;;  %v677_v6 = vpack.c.bf16 %v72_v1, %v71_v0  ;;  %v221_v12 = vld [vmem:[%s1004_s2] sm:$0xff]  ;;  %s704_s7 = scalar_lea.vmem %s477_s30, 128  ;;  %p709_p1 = scmp.lt.s32.totalorder %s477_s30, %s477_s30 }
  0x18   :  { %673 = vmatprep.subr.bf16.mxu1 %v728_v7  ;;  %v73_v9 = vld [vmem:[%s1003_s1 + $0x170] sm:$0xff]  ;;  %v74_v10 = vld [vmem:[%s1003_s1 + $0x178] sm:$0xff]  ;;  %v656_v11 = vpack.c.bf16 %v42_v5, %v41_v4  ;;  %v222_v13 = vld [vmem:[%s1004_s2 + $0x8] sm:$0xff]  ;;  %p705_p0 = scmp.ne.s32.totalorder %s477_s30, %s704_s7  ;;  %p710_p2 = scmp.lt.s32.totalorder %s704_s7, %s704_s7 }
  0x19   :  { %649 = vmatpush3.bf16.msra.mxu0 %v648_v57  ;;  %v680_v14 = vpack.c.bf16 %v74_v10, %v73_v9  ;;  %v24_v15 = vld [vmem:[%s1002_s0] sm:$0xff]  ;;  %v683_v16 = vpack.c.bf16 %v222_v13, %v221_v12  ;;  %v223_v17 = vld [vmem:[%s1004_s2 + $0x10] sm:$0xff]  ;;  %v224_v18 = vld [vmem:[%s1004_s2 + $0x18] sm:$0xff] }
  0x1a   :  { %651 = vmatprep.subr.bf16.mxu0 %v650_v58  ;;  %v26_v19 = vld [vmem:[%s1002_s0 + $0x10] sm:$0xff]  ;;  %v686_v20 = vpack.c.bf16 %v224_v18, %v223_v17  ;;  %v225_v21 = vld [vmem:[%s1004_s2 + $0x20] sm:$0xff]  ;;  %v226_v22 = vld [vmem:[%s1004_s2 + $0x28] sm:$0xff]  ;;  %p711_p3 = por %p710_p2, %p709_p1 }
  0x1b   :  { %675 = vmatpush3.bf16.msra.mxu1 %v674_v61  ;;  %v689_v23 = vpack.c.bf16 %v226_v22, %v225_v21  ;;  %v227_v24 = vld [vmem:[%s1004_s2 + $0x30] sm:$0xff]  ;;  %v228_v25 = vld [vmem:[%s1004_s2 + $0x38] sm:$0xff]  ;;  %v308_v27 = vld [vmem:[%s1005_s3] sm:$0xff] }
  0x1c   :  { %676 = vmatprep.subr.bf16.mxu1 %v728_v7  ;;  %v692_v26 = vpack.c.bf16 %v228_v25, %v227_v24  ;;  %v309_v28 = vld [vmem:[%s1005_s3 + $0x8] sm:$0xff]  ;;  %v484_v32 = vld [vmem:[%s1007_s5] ss:$0 sm:$0xff]  ;;  %v485_v40 = vld [vmem:[%s1007_s5 + $0x1] ss:$0 sm:$0xff]  ;;  %p712_p4 = pnand %p711_p3, %p705_p0 }
  0x1d   :  { %653 = vmatpush3.bf16.msra.mxu0 %v652_v2  ;;  %v695_v29 = vpack.c.bf16 %v309_v28, %v308_v27  ;;  %v389_v39 = vld [vmem:[%s1006_s4] sm:$0xff] }
  0x1e   :  { %655 = vmatprep.subr.bf16.mxu0 %v654_v3  ;;  %v487_v45 = vld [vmem:[%s1007_s5 + $0x2] ss:$0 sm:$0xff]  ;;  %v489_v49 = vld [vmem:[%s1007_s5 + $0x3] ss:$0 sm:$0xff] }
  0x1f   :  { %678 = vmatpush3.bf16.msra.mxu1 %v677_v6 }
  0x20   :  { %679 = vmatprep.subr.bf16.mxu1 %v728_v7 }
  0x21   :  { %657 = vmatpush3.bf16.msra.mxu0 %v656_v11 }
  0x22   :  { %682 = vmatprep.subr.bf16.mxu0 %v728_v7 }
  0x23   :  { %681 = vmatpush3.bf16.msra.mxu1 %v680_v14 }
  0x24   :  { %145 = vmatmul.mubr.f32.vlgmr.msra.gmra.mrb[0].mxu0 %v24_v15  ;;  %694 = vmatprep.subr.bf16.mxu1 %v728_v7 }
  0x25   :  { %684 = vmatpush3.bf16.msra.mxu0 %v683_v16  ;;  %609 = vmatprep.mubr.msk.f32.mxu0 %vm729_vm0, %v730_v8 }
  0x26   :  { %591 = vmatmul.mubr.f32.vlgmr.msra.gmra.mrb[0].mxu1 %v26_v19  ;;  %685 = vmatprep.subr.bf16.mxu0 %v728_v7 }
  0x27   :  { %616 = vmatprep.mubr.msk.f32.mxu1 %vm729_vm0, %v730_v8  ;;  %696 = vmatpush3.bf16.msra.mxu1 %v695_v29 }
  0x28   :  { %697 = vmatprep.subr.bf16.mxu1 %v728_v7 }
  0x29   :  { %687 = vmatpush3.bf16.msra.mxu0 %v686_v20 }
  0x2a   :  { %688 = vmatprep.subr.bf16.mxu0 %v728_v7 }
  0x2d   :  { %690 = vmatpush3.bf16.msra.mxu0 %v689_v23 }
  0x2e   :  { %691 = vmatprep.subr.bf16.mxu0 %v728_v7  ;;  %v390_v7 = vld [vmem:[%s1006_s4 + $0x8] sm:$0xff] }
  0x2f   :  { %v698_v42 = vpack.c.bf16 %v390_v7, %v389_v39 }
  0x31   :  { %693 = vmatpush3.bf16.msra.mxu0 %v692_v26 }
  0xf7   :  { %v523_v30 = vpop.f32.mrb[0].mxu0 }
  0xf8   :  { %v524_v31 = vpop.f32.mrb[1].mxu0 }
  0xf9   :  { %v525_v33 = vadd.f32 %v524_v31, %v523_v30  ;;  %v216_v34 = vpop.f32.mrb[0].mxu1 }
  0xfa   :  { %v592_v35 = vpop.f32.mrb[1].mxu1 }
  0xfb   :  { %v147_v36 = vadd.f32 %v525_v33, %v484_v32 }
  0xfd   :  { %v217_v37 = vadd.f32 %v216_v34, %v147_v36 }
  0xff   :  { %v220_v38 = vmax.f32 %v217_v37, 0.0 }
 0x101   :  { %610 = vmatmul.mubr.msk.f32.vlgmr.msra.gmra.mrb[2].mxu0 %vm234_vm1, %v220_v38 }
 0x1d4   :  { %v304_v41 = vpop.f32.mrb[2].mxu0 }
 0x1d5   :  { %v305_v43 = vadd.f32 %v485_v40, %v304_v41  ;;  %v611_v44 = vpop.f32.mrb[3].mxu0 }
 0x1d7   :  { %617 = vmatmul.mubr.msk.f32.vlgmr.msra.gmra.mrb[2].mxu1 %vm315_vm2, %v305_v43 }
 0x1d8   :  { %699 = vmatpush3.bf16.msra.mxu1 %v698_v42  ;;  %623 = vmatprep.mubr.msk.f32.mxu1 %vm729_vm0, %v730_v8 }
 0x2aa   :  { %v385_v46 = vpop.f32.mrb[2].mxu1 }
 0x2ab   :  { %v386_v47 = vadd.f32 %v487_v45, %v385_v46  ;;  %v618_v48 = vpop.f32.mrb[3].mxu1 }
 0x2ad   :  { %624 = vmatmul.mubr.msk.f32.vlgmr.msra.gmra.mrb[4].mxu1 %vm315_vm2, %v386_v47 }
 0x380   :  { %v465_v50 = vpop.f32.mrb[4].mxu1 }
 0x381   :  { %v466_v51 = vadd.f32 %v489_v49, %v465_v50  ;;  %v625_v52 = vpop.f32.mrb[5].mxu1 }
 0x383   :  { %469 = vst [vmem:[#allocation2] sm:$0xff] %v466_v51 }
 0x384   :  { %715 = shalt.err (!%p712_p4)
}
 0x385   :  { %s716_s10 = scalar_lea.hbm %s1008_s6, 128 }
 0x386   :  { %p717_p5 = scmp.ne.s32.totalorder %s1008_s6, %s716_s10  ;;  %p720_p6 = scmp.lt.u32.totalorder %s716_s10, %s1008_s6 }
 0x388   :  { %p722_p7 = pnand %p720_p6, %p717_p5 }
 0x38a   :  { %725 = shalt.err (!%p722_p7)
}
 0x38b   :  { %479 = dma.vmem_to_hbm [thread:$0]  %s477_s30, 128, %s1008_s6, [#allocation3]  }
 0x38c   :  { %726 = dma.done.wait [#allocation3], 128  }
 0x38d   :  { %727 = vsyncadd [#allocation3], 4294967168 }
 0x38e   :  { %483 = vsyncpa [#allocation3], 1 }

</bundles_post_ra>
